<compile_context>
chip_gen: v5e
topology: v5e:2x2
jax: 0.10.0
libtpu: 0.0.40
codegen_flags: <defaults>
</compile_context>

<pallas_src>
import math

import jax
import jax.numpy as jnp
from jax.experimental import pallas as pl
from jax.experimental.pallas import tpu as pltpu


def _round_up(x, m):
    return ((x + m - 1) // m) * m


def _vmem_budget_bytes():
    """Per-chip scoped-VMEM budget with headroom for compiler-internal scratch."""
    cap = 64 * 1024 * 1024  # conservative fallback (v7x physical VMEM per TC)
    try:
        info = pltpu.get_tpu_info()
        cap = int(getattr(info, "vmem_capacity_bytes", cap))
    except Exception:
        pass
    # Leave ~16 MiB headroom; never ask for more than ~100 MiB (v5e/v6e have 128 MiB).
    return max(min(cap - 16 * 1024 * 1024, 100 * 1024 * 1024), 32 * 1024 * 1024)


# ---------------------------------------------------------------------------
# Kernels
# ---------------------------------------------------------------------------

def _ffn_kernel_resident(x_ref, w1_ref, b1_ref, w2_ref, b2_ref, o_ref):
    """Weights fully VMEM-resident: one row tile per grid step, no reduction axis."""
    h = jnp.dot(x_ref[...], w1_ref[...], preferred_element_type=jnp.float32)
    h = jnp.maximum(h + b1_ref[...], 0.0)
    # TODO(synk): training-mode dropout mask would be applied to `h` here.
    o_ref[...] = (jnp.dot(h.astype(jnp.bfloat16), w2_ref[...],
                          preferred_element_type=jnp.float32)
                  + b2_ref[...]).astype(o_ref.dtype)


def _ffn_kernel_chunked(x_ref, w1_ref, b1_ref, w2_ref, b2_ref, o_ref):
    """PF-chunked reduction; accumulate directly into the resident f32 output block."""
    k = pl.program_id(1)

    h = jnp.dot(x_ref[...], w1_ref[...], preferred_element_type=jnp.float32)
    h = jnp.maximum(h + b1_ref[...], 0.0)
    # TODO(synk): training-mode dropout mask would be applied to `h` here.
    contrib = jnp.dot(h.astype(jnp.bfloat16), w2_ref[...],
                      preferred_element_type=jnp.float32)

    @pl.when(k == 0)
    def _():
        o_ref[...] = contrib

    @pl.when(k != 0)
    def _():
        o_ref[...] += contrib

    @pl.when(k == pl.num_programs(1) - 1)
    def _():
        o_ref[...] += b2_ref[...]


# ---------------------------------------------------------------------------
# One-time parameter preparation (hoisted out of the per-call path)
# ---------------------------------------------------------------------------

def prepare_ffn_params(w1, b1, w2, b2, *, tpf=512):
    """Cast / transpose / relayout the static FFN weights once.

    w1: [PF, H], b1: [PF]   (PyTorch nn.Linear layout: W is [out, in])
    w2: [H, PF], b2: [H]
    """
    PF, H = w1.shape
    budget = _vmem_budget_bytes()
    tm_nominal = 1024 if budget >= 90 * 1024 * 1024 else 512

    w1t = w1.T.astype(jnp.bfloat16)            # [H, PF]   contract on leading dim
    w2t = w2.T.astype(jnp.bfloat16)            # [PF, H]   contract on leading dim
    b1f = b1.astype(jnp.float32)
    b2f = b2.astype(jnp.float32).reshape(1, H)

    # VMEM estimate for the weight-resident fast path (2x-buffered tiles + h intermediate).
    resident_est = (2 * tm_nominal * H * 2            # x tiles (bf16)
                    + 2 * 2 * H * PF * 2              # W1^T + W2^T (bf16, 2x buffers)
                    + 2 * tm_nominal * H * 4          # out tiles (f32)
                    + tm_nominal * PF * 6)            # h f32 + its bf16 copy
    resident = resident_est + (4 << 20) <= budget

    params = {"mode": "resident" if resident else "chunked",
              "H": H, "PF": PF, "vmem_budget": budget, "tm_nominal": tm_nominal}

    if resident:
        params.update(w1t=w1t, b1f=b1f.reshape(1, PF), w2t=w2t, b2f=b2f, pf_pad=PF)
    else:
        tpf = max(128, (min(tpf, PF) // 128) * 128)
        pf_pad = _round_up(PF, tpf)
        if pf_pad != PF:
            # Zero-padded PF slots contribute relu(0 + 0) @ 0 == 0: mathematically exact.
            w1t = jnp.pad(w1t, ((0, 0), (0, pf_pad - PF)))
            w2t = jnp.pad(w2t, ((0, pf_pad - PF), (0, 0)))
            b1f = jnp.pad(b1f, (0, pf_pad - PF))
        n_k = pf_pad // tpf
        # Chunk-major W1^T: each [H, tpf] PF-chunk is a contiguous HBM slab (dense DMA).
        w1c = jnp.transpose(w1t.reshape(H, n_k, tpf), (1, 0, 2))
        b1c = b1f.reshape(n_k, 1, tpf)
        params.update(w1c=w1c, b1c=b1c, w2t=w2t, b2f=b2f,
                      pf_pad=pf_pad, tpf=tpf, n_k=n_k)
    return params


# ---------------------------------------------------------------------------
# Per-call wrapper
# ---------------------------------------------------------------------------

def position_feedforward_prepared(x, params, *, tm=None):
    """Fused FFN using pre-prepared weights. x: [..., H] -> [..., H] float32."""
    orig_shape = x.shape
    H = params["H"]
    budget = params["vmem_budget"]

    x2 = x.reshape(-1, H).astype(jnp.bfloat16)
    N = x2.shape[0]

    if tm is None:
        tm = params["tm_nominal"]
    if N <= tm:
        # Shrink the row tile for small N; keep >= 2 row tiles when possible so both
        # v7x TensorCores get work under the "parallel" row axis.
        tm = _round_up(-(-N // 2), 8) if N > 8 else _round_up(max(N, 1), 8)

    n_pad = _round_up(N, tm)
    if n_pad != N:
        x2 = jnp.pad(x2, ((0, n_pad - N), (0, 0)))
    n_rows = n_pad // tm

    pf_total = params["pf_pad"]
    flops = 4 * n_pad * H * pf_total
    w_bytes = 2 * H * pf_total * 2  # both bf16 weights

    if params["mode"] == "resident":
        cost = pl.CostEstimate(flops=flops, transcendentals=0,
                               bytes_accessed=n_pad * H * 2 + w_bytes + n_pad * H * 4)
        PF = params["PF"]
        out = pl.pallas_call(
            _ffn_kernel_resident,
            out_shape=jax.ShapeDtypeStruct((n_pad, H), jnp.float32),
            grid=(n_rows,),
            in_specs=[
                pl.BlockSpec((tm, H), lambda i: (i, 0)),       # x row tile
                pl.BlockSpec((H, PF), lambda i: (0, 0)),       # W1^T  (resident)
                pl.BlockSpec((1, PF), lambda i: (0, 0)),       # b1    (resident)
                pl.BlockSpec((PF, H), lambda i: (0, 0)),       # W2^T  (resident)
                pl.BlockSpec((1, H), lambda i: (0, 0)),        # b2    (resident)
            ],
            out_specs=pl.BlockSpec((tm, H), lambda i: (i, 0)),
            compiler_params=pltpu.CompilerParams(
                dimension_semantics=("parallel",),
                vmem_limit_bytes=budget,
            ),
            cost_estimate=cost,
        )(x2, params["w1t"], params["b1f"], params["w2t"], params["b2f"])
    else:
        tpf, n_k = params["tpf"], params["n_k"]
        cost = pl.CostEstimate(
            flops=flops, transcendentals=0,
            bytes_accessed=n_pad * H * 2 + n_rows * w_bytes + n_pad * H * 4)
        out = pl.pallas_call(
            _ffn_kernel_chunked,
            out_shape=jax.ShapeDtypeStruct((n_pad, H), jnp.float32),
            grid=(n_rows, n_k),
            in_specs=[
                pl.BlockSpec((tm, H), lambda i, k: (i, 0)),            # x row tile
                pl.BlockSpec((None, H, tpf), lambda i, k: (k, 0, 0)),  # W1^T chunk (dense slab)
                pl.BlockSpec((None, 1, tpf), lambda i, k: (k, 0, 0)),  # b1 chunk
                pl.BlockSpec((tpf, H), lambda i, k: (k, 0)),           # W2^T chunk
                pl.BlockSpec((1, H), lambda i, k: (0, 0)),             # b2
            ],
            out_specs=pl.BlockSpec((tm, H), lambda i, k: (i, 0)),
            compiler_params=pltpu.CompilerParams(
                dimension_semantics=("parallel", "arbitrary"),
                vmem_limit_bytes=budget,
            ),
            cost_estimate=cost,
        )(x2, params["w1c"], params["b1c"], params["w2t"], params["b2f"])

    return out[:N].reshape(orig_shape).astype(jnp.float32)


def position_feedforward(x, w1, b1, w2, b2, **kw):
    """Convenience wrapper (preps weights per call; hoist prepare_ffn_params for real use)."""
    return position_feedforward_prepared(x, prepare_ffn_params(w1, b1, w2, b2), **kw)


# ---------------------------------------------------------------------------
# Main
# ---------------------------------------------------------------------------

if __name__ == "__main__":
    B, T = 2, 8
    hidden_dim, pf_dim = 32, 64

    key = jax.random.PRNGKey(0)
    kx, kw1, kb1, kw2, kb2 = jax.random.split(key, 5)

    x = jax.random.normal(kx, (B, T, hidden_dim), jnp.float32)

    # PyTorch nn.Linear init: U(-1/sqrt(fan_in), 1/sqrt(fan_in)), W stored [out, in].
    bnd1 = 1.0 / math.sqrt(hidden_dim)
    w1 = jax.random.uniform(kw1, (pf_dim, hidden_dim), jnp.float32, -bnd1, bnd1)
    b1 = jax.random.uniform(kb1, (pf_dim,), jnp.float32, -bnd1, bnd1)
    bnd2 = 1.0 / math.sqrt(pf_dim)
    w2 = jax.random.uniform(kw2, (hidden_dim, pf_dim), jnp.float32, -bnd2, bnd2)
    b2 = jax.random.uniform(kb2, (hidden_dim,), jnp.float32, -bnd2, bnd2)

    # One-time parameter prep (hoisted out of the per-call path), then the fused kernel.
    ffn_params = prepare_ffn_params(w1, b1, w2, b2)
    out = position_feedforward_prepared(x, ffn_params)
    jax.block_until_ready(out)

    # Pure-JAX f32 reference (dropout is identity in eval mode).
    h_ref = jnp.maximum(jnp.einsum("bth,ph->btp", x, w1) + b1, 0.0)
    ref = jnp.einsum("btp,hp->bth", h_ref, w2) + b2

    assert out.shape == (B, T, hidden_dim)
    assert jnp.all(jnp.isfinite(out))
    # bf16 MXU operands with f32 accumulation -> loose tolerance vs. pure-f32 reference.
    max_err = float(jnp.max(jnp.abs(out - ref)))
    assert max_err < 5e-2, f"max abs error {max_err}"

    print("KERNEL_OK")
</pallas_src>

<mosaic_0001>
module attributes {stable_mosaic.version = 11 : i64} {
  func.func @_ffn_kernel_resident(%arg0: i32, %arg1: memref<8x32xbf16, #tpu.memory_space<vmem>>, %arg2: memref<32x64xbf16, #tpu.memory_space<vmem>>, %arg3: memref<1x64xf32, #tpu.memory_space<vmem>>, %arg4: memref<64x32xbf16, #tpu.memory_space<vmem>>, %arg5: memref<1x32xf32, #tpu.memory_space<vmem>>, %arg6: memref<8x32xf32, #tpu.memory_space<vmem>>) attributes {dimension_semantics = [#tpu.dimension_semantics<parallel>], iteration_bounds = array<i64: 2>, scalar_prefetch = 0 : i64, scratch_operands = 0 : i64, tpu.core_type = #tpu.core_type<tc>, window_params = [{transform_indices = @transform_0, window_bounds = array<i64: 8, 32>}, {pipeline_mode = #tpu.pipeline_mode<synchronous>, transform_indices = @transform_1, window_bounds = array<i64: 32, 64>}, {pipeline_mode = #tpu.pipeline_mode<synchronous>, transform_indices = @transform_2, window_bounds = array<i64: 1, 64>}, {pipeline_mode = #tpu.pipeline_mode<synchronous>, transform_indices = @transform_3, window_bounds = array<i64: 64, 32>}, {pipeline_mode = #tpu.pipeline_mode<synchronous>, transform_indices = @transform_4, window_bounds = array<i64: 1, 32>}, {transform_indices = @transform_5, window_bounds = array<i64: 8, 32>}]} {
    %c0 = arith.constant 0 : index
    %c0_0 = arith.constant 0 : index
    %0 = vector.load %arg1[%c0, %c0_0] : memref<8x32xbf16, #tpu.memory_space<vmem>>, vector<8x32xbf16>
    %c0_1 = arith.constant 0 : index
    %c0_2 = arith.constant 0 : index
    %1 = vector.load %arg2[%c0_1, %c0_2] : memref<32x64xbf16, #tpu.memory_space<vmem>>, vector<32x64xbf16>
    %cst = arith.constant dense<0.000000e+00> : vector<8x64xf32>
    %2 = tpu.matmul %0, %1, %cst {dimension_numbers = #tpu.dot_dimension_numbers<[1], [0], [0], [1], [0, 0, 1, 1], [], []>} : vector<8x32xbf16>, vector<32x64xbf16>, vector<8x64xf32> -> vector<8x64xf32>
    %c0_3 = arith.constant 0 : index
    %c0_4 = arith.constant 0 : index
    %3 = vector.load %arg3[%c0_3, %c0_4] : memref<1x64xf32, #tpu.memory_space<vmem>>, vector<1x64xf32>
    %4 = vector.broadcast %3 : vector<1x64xf32> to vector<8x64xf32>
    %5 = arith.addf %2, %4 : vector<8x64xf32>
    %cst_5 = arith.constant 0.000000e+00 : f32
    %6 = vector.broadcast %cst_5 : f32 to vector<8x64xf32>
    %7 = arith.maximumf %5, %6 : vector<8x64xf32>
    %8 = arith.truncf %7 : vector<8x64xf32> to vector<8x64xbf16>
    %c0_6 = arith.constant 0 : index
    %c0_7 = arith.constant 0 : index
    %9 = vector.load %arg4[%c0_6, %c0_7] : memref<64x32xbf16, #tpu.memory_space<vmem>>, vector<64x32xbf16>
    %cst_8 = arith.constant dense<0.000000e+00> : vector<8x32xf32>
    %10 = tpu.matmul %8, %9, %cst_8 {dimension_numbers = #tpu.dot_dimension_numbers<[1], [0], [0], [1], [0, 0, 1, 1], [], []>} : vector<8x64xbf16>, vector<64x32xbf16>, vector<8x32xf32> -> vector<8x32xf32>
    %c0_9 = arith.constant 0 : index
    %c0_10 = arith.constant 0 : index
    %11 = vector.load %arg5[%c0_9, %c0_10] : memref<1x32xf32, #tpu.memory_space<vmem>>, vector<1x32xf32>
    %12 = vector.broadcast %11 : vector<1x32xf32> to vector<8x32xf32>
    %13 = arith.addf %10, %12 : vector<8x32xf32>
    %c0_11 = arith.constant 0 : index
    %c0_12 = arith.constant 0 : index
    %14 = vector.load %arg6[%c0_11, %c0_12] : memref<8x32xf32, #tpu.memory_space<vmem>>, vector<8x32xf32>
    tpu.vector_store %arg6[%c0_11, %c0_12], %13 {strides = array<i32>} : memref<8x32xf32, #tpu.memory_space<vmem>>, vector<8x32xf32>,
    return
  }
  func.func @transform_0(%arg0: i32) -> (i32, i32) {
    %c0_i32 = arith.constant 0 : i32
    %c0_i32_0 = arith.constant 0 : i32
    return %arg0, %c0_i32 : i32, i32
  }
  func.func @transform_1(%arg0: i32) -> (i32, i32) {
    %c0_i32 = arith.constant 0 : i32
    %c0_i32_0 = arith.constant 0 : i32
    %c0_i32_1 = arith.constant 0 : i32
    return %c0_i32, %c0_i32_0 : i32, i32
  }
  func.func @transform_2(%arg0: i32) -> (i32, i32) {
    %c0_i32 = arith.constant 0 : i32
    %c0_i32_0 = arith.constant 0 : i32
    %c0_i32_1 = arith.constant 0 : i32
    return %c0_i32, %c0_i32_0 : i32, i32
  }
  func.func @transform_3(%arg0: i32) -> (i32, i32) {
    %c0_i32 = arith.constant 0 : i32
    %c0_i32_0 = arith.constant 0 : i32
    %c0_i32_1 = arith.constant 0 : i32
    return %c0_i32, %c0_i32_0 : i32, i32
  }
  func.func @transform_4(%arg0: i32) -> (i32, i32) {
    %c0_i32 = arith.constant 0 : i32
    %c0_i32_0 = arith.constant 0 : i32
    %c0_i32_1 = arith.constant 0 : i32
    return %c0_i32, %c0_i32_0 : i32, i32
  }
  func.func @transform_5(%arg0: i32) -> (i32, i32) {
    %c0_i32 = arith.constant 0 : i32
    %c0_i32_0 = arith.constant 0 : i32
    return %arg0, %c0_i32 : i32, i32
  }
}

</mosaic_0001>

<bundles_post_ra>
// kernel: tpu_custom_call.1
= control target key start
LH: loop header
LB: loop body
LE: loop exit
PB: predicated region body
PF: predicated region fallthrough
CT: control target
= control target key end

     0   :  { %10 = vsyncpa [#allocation3], 0  ;;  %s678_s0 = inlined_call_operand.vmem [shape: bf16[16,32], index: 0, kind: input, shape index: {}]   ;;  %s679_s1 = inlined_call_operand.vmem [shape: bf16[32,64], index: 1, kind: input, shape index: {}]   ;;  %s680_s2 = inlined_call_operand.vmem [shape: f32[1,64], index: 2, kind: input, shape index: {}]   ;;  %s681_s3 = inlined_call_operand.vmem [shape: bf16[64,32], index: 3, kind: input, shape index: {}]   ;;  %s682_s4 = inlined_call_operand.vmem [shape: f32[1,32], index: 4, kind: input, shape index: {}]   ;;  %s683_s5 = inlined_call_operand.hbm [shape: f32[16,32], index: 5, kind: output, shape index: {}]  }
   0x1   :  { %12 = vsyncpa [#allocation3 + $0x1], 0  ;;  %s567_s18 = smov 0   ;;  %s569_s19 = smov 0  }
   0x2   :  { %s571_s20 = smov 0   ;;  %s573_s21 = smov 0  }
   0x3 LB: > { %s588_s22 = sadd.s32 4294967295, %s535_s21   ;;  %s390_s23 = sadd.s32 4294967294, %s535_s21   ;;  %s535_s21 = sphi %s573_s21, %s689_s21   ;;  %s531_s20 = sphi %s571_s20, %s688_s20   ;;  %s527_s19 = sphi %s569_s19, %s687_s19   ;;  %s523_s18 = sphi %s567_s18, %s686_s18  }
   0x4   : > { %s592_s24 = sadd.s32 1, %s535_s21   ;;  %s135_s25 = sadd.s32 1, %s531_s20 }
   0x5   : > { %s132_s26 = ssub.s32 %s535_s21, %s592_s24  ;;  %p145_p0 = scmp.ne.s32.totalorder %s531_s20, %s527_s19 }
   0x6   : > { %p133_p1 = scmp.eq.s32.totalorder %s132_s26, 0  ;;  %p146_p2 = scmp.eq.s32.totalorder %s588_s22, 1 }
   0x7   : > { %p151_p3 = scmp.ne.s32.totalorder %s527_s19, %s523_s18  ;;  %p152_p4 = scmp.eq.s32.totalorder %s390_s23, 1 }
   0x8   : > { %s603_s27 = scalar_select %p133_p1, %s531_s20, %s135_s25  }
   0x9   : > { %p605_p5 = por %p146_p2, %p145_p0  ;;  %p609_p6 = por %p152_p4, %p151_p3 }
   0xa   : > { %p393_p7 = scmp.ge.s32.totalorder %s535_s21, 1  ;;  %p189_p8 = scmp.lt.s32.totalorder %s535_s21, 3 }
   0xc   : > { %p190_p9 = pnand %p393_p7, %p189_p8 }
   0xd   : > { %p216_p10 = scmp.lt.s32.totalorder (!%p190_p9), %s588_s22, 1  ;;  %s213_s8 = sand.u32 (!%p190_p9), 1, %s527_s19  }
   0xe   : > { %193 = sbr.rel (%p190_p9) target bundleno = 293 (0x125), region = 40  ;;  %s423_s9 = sshll.u32 (!%p190_p9), %s588_s22, 3 }
   0xf   : > { %s394_s10 = sshll.u32 (!%p190_p9), %s213_s8, 3  ;;  %s326_s13 = scalar_lea.hbm (!%p190_p9), %s683_s5, %s423_s9 }
  0x10   : > { %s215_s16 = scalar_lea.vmem (!%p190_p9), [#allocation2], %s394_s10  ;;  %s330_s23 = sshll.u32 (!%p190_p9), %s326_s13, 4  ;;  %s331_s23 = int_to_ptr.hbm [resolvable:$true] %s330_s23 }
  0x11   : > { %s487_s25 = sshra.s32 (!%p190_p9), %s331_s23, 4  ;;  %s493_s7 = scalar_lea.hbm (!%p190_p9), %s683_s5, 16  ;;  %s488_s25 = int_to_ptr.hbm [resolvable:$true] %s487_s25 }
  0x12   : > { %s489_s26 = scalar_lea.hbm (!%p190_p9), %s488_s25, 8  ;;  %p494_p0 = scmp.lt.s32.totalorder (!%p190_p9), %s488_s25, %s683_s5 }
  0x13   : > { %v427_v0 = vld [vmem:[%s679_s1 + $0x8] sm:$0xff]  ;;  %v431_v1 = vld [vmem:[%s681_s3 + $0x18] sm:$0xff]  ;;  %v426_v2 = vld [vmem:[%s679_s1] sm:$0xff]  ;;  %s217_s11 = scalar_select %p216_p10, %s588_s22, 1  ;;  %vm242_vm0 = vcmask 261120   ;;  %vm297_vm1 = vcmask 523264  }
  0x14   : > { %252 = vmatpush.bf16.msra.mxu0 %v427_v0  ;;  %305 = vmatpush.bf16.msra.mxu1 %v431_v1  ;;  %v430_v3 = vld [vmem:[%s681_s3 + $0x10] sm:$0xff]  ;;  %v429_v5 = vld [vmem:[%s681_s3 + $0x8] sm:$0xff]  ;;  %v428_v6 = vld [vmem:[%s681_s3] sm:$0xff]  ;;  %s316_s22 = scalar_lea.sflag [#allocation3], %s213_s8  ;;  %p490_p11 = scmp.ne.s32.totalorder %s488_s25, %s489_s26 }
  0x15   : > { %s395_s14 = sshll.u32 %s217_s11, 2  ;;  %v471_v7 = vld [vmem:[%s680_s2] ss:$0 sm:$0xff]  ;;  %p495_p1 = scmp.lt.s32.totalorder %s493_s7, %s489_s26 }
  0x16   : > { %s219_s17 = scalar_lea.vmem %s678_s0, %s395_s14  ;;  %v472_v13 = vld [vmem:[%s682_s4] ss:$0 sm:$0xff]  ;;  %p491_p12 = pnand %p490_p11, %p605_p5 }
  0x17   : > { %v221_v4 = vld [vmem:[%s219_s17] sm:$0xf]  ;;  %s328_s17 = sshll.u32 %s215_s16, 4  ;;  %p496_p2 = por %p495_p1, %p494_p0  ;;  %s329_s17 = int_to_ptr.vmem [resolvable:$true] %s328_s17 }
  0x18   : > { %253 = vmatpush.bf16.msra.mxu0 %v426_v2  ;;  %306 = vmatpush.bf16.msra.mxu1 %v430_v3  ;;  %p492_p13 = pneg %p491_p12 }
  0x1a   : > { %p497_p3 = pnand %p496_p2, %p492_p13 }
  0x1b   : > { %404 = vmatmul.msk.bf16.vlgmr.msra.gmra.mxu0 %vm242_vm0, %v221_v4 }
  0x1c   : > { %307 = vmatpush.bf16.msra.mxu1 %v429_v5 }
  0x20   : > { %308 = vmatpush.bf16.msra.mxu1 %v428_v6 }
  0x98   : > { %v255_v8 = vpop.f32.mrf.mxu0 }
  0x99   : > { %v256_v9 = vadd.f32 %v471_v7, %v255_v8 }
  0x9b   : > { %v259_v10 = vmax.f32 %v256_v9, 0.0 }
  0x9d   : > { %v260_v11 = vpack.c.bf16 %v259_v10, %v259_v10 }
  0x9f   : > { %421 = vmatmul.msk.bf16.vlgmr.msra.gmra.mxu1 %vm297_vm1, %v260_v11 }
  0xa0   : > { %v257_v12 = vpop.f32.mrf.mxu0 }
 0x11c   : > { %v310_v14 = vpop.f32.mrf.mxu1 }
 0x11d   : > { %v311_v15 = vadd.f32 %v472_v13, %v310_v14 }
 0x11f   : > { %314 = vst.msk [vmem:[%s215_s16] sm:$0xff] %vm242_vm0, %v311_v15 }
 0x120   : > { %500 = shalt.err (!%p497_p3)
}
 0x121   : > { %432 = dma.vmem_to_hbm [thread:$0]  (%p605_p5), %s329_s17, 128, %s331_s23, %s316_s22  }
 0x124   : > { %v312_v16 = vpop.f32.mrf.mxu1 }
 0x125 PF: > { %p438_p4 = scmp.ge.s32.totalorder %s535_s21, 2  ;;  %s342_s8 = sand.u32 1, %s523_s18  }
 0x126   : > { %s343_s11 = scalar_lea.sflag [#allocation3], %s342_s8 }
 0x127   : > { %p435_p7 = pnand %p438_p4, %p609_p6 }
 0x129   : > { %p436_p8 = pneg %p435_p7 }
 0x12b   : > { %518 = dma.done.wait (%p436_p8), %s343_s11, 128  }
 0x12c   : > { %520 = vsyncadd (%p436_p8), %s343_s11, 4294967168  ;;  %p15_p9 = scmp.ge.s32.totalorder %s592_s24, 4   ;;  %s686_s18 = smov %s527_s19 }
 0x12d   : > { %s687_s19 = smov %s531_s20  ;;  %s688_s20 = smov %s603_s27 }
 0x12e   : > { %s689_s21 = smov %s592_s24  ;;  %17 = sbr.rel (!%p15_p9) target bundleno = 3 (0x3), region = 75 }
 0x133   :  { %349 = vsyncpa [#allocation3], 1 }
 0x134   :  { %351 = vsyncpa [#allocation3 + $0x1], 1 }

</bundles_post_ra>
